<compile_context>
chip_gen: v5e
topology: v5e:2x2
jax: 0.10.0
libtpu: 0.0.40
codegen_flags: <defaults>
</compile_context>

<pallas_src>
import jax
import jax.numpy as jnp
from jax.experimental import pallas as pl
from jax.experimental.pallas import tpu as pltpu


def _phm_linear_kernel(x_ref, wt_ref, b_ref, o_ref):
    # x_ref : (b_tile, in_features)   VMEM, streamed over the batch grid axis
    # wt_ref: (in_features, n_tile)   VMEM, resident (1 N-tile) or streamed over N
    # b_ref : (1, n_tile) f32         VMEM, resident / streamed with W_T
    # o_ref : (b_tile, n_tile)        VMEM, streamed; lane-dense store
    acc = jnp.dot(x_ref[...], wt_ref[...], preferred_element_type=jnp.float32)
    o_ref[...] = (acc + b_ref[...]).astype(o_ref.dtype)


def _round_up(v, m):
    return ((v + m - 1) // m) * m


def _block_spec(shape, index_map, *, buffer_count=None):
    # Construction-time guard: fall back to default buffering if pipeline_mode /
    # pl.Buffered is unavailable in the running JAX version.
    if buffer_count is not None:
        try:
            return pl.BlockSpec(shape, index_map, pipeline_mode=pl.Buffered(buffer_count))
        except Exception:
            pass
    return pl.BlockSpec(shape, index_map)


def phm_linear(x, A, S, bias, *, n, compute_dtype=None, max_batch_tile=1024):
    """x: (B, in_features), A: (n,n,n), S: (n, out/n, in/n), bias: (out,)."""
    B, in_features = x.shape
    out_n, in_n = S.shape[1], S.shape[2]
    out_features = out_n * n
    assert in_features == in_n * n

    # Effective TRANSPOSED weight, built once (wrapper-side; tiny vs B*in*out):
    #   W.T[r*in_n + s, p*out_n + q] = sum_i A[i, p, r] * S[i, q, s]
    w_t = jnp.einsum("ipr,iqs->rspq", A, S).reshape(in_features, out_features)
    if compute_dtype is not None:
        w_t = w_t.astype(compute_dtype)          # bf16: native MXU input, halves VMEM/HBM
    # F.linear: input is cast to the weight dtype before the matmul.
    if x.dtype != w_t.dtype:
        x = x.astype(w_t.dtype)
    # Bias pre-cast once to the f32 accumulator dtype (no per-iteration VPU cast).
    bias2d = bias.reshape(1, out_features).astype(jnp.float32)

    itemsize = jnp.dtype(w_t.dtype).itemsize

    # ---- generation-aware VMEM budget ----
    try:
        vmem_cap = int(pltpu.get_tpu_info().vmem_capacity_bytes)
    except Exception:
        vmem_cap = 128 * 1024 * 1024
    vmem_budget = int(0.75 * vmem_cap)           # headroom for compiler internal scratch

    # ---- out_features (N) tiling: keep the weight slab inside VMEM ----
    resident_budget = vmem_budget // 3
    w_bytes = in_features * out_features * itemsize
    if w_bytes <= resident_budget or out_features % 128 != 0:
        n_tile = out_features                    # fully VMEM-resident weight
    else:
        n_tile = out_features
        while in_features * n_tile * itemsize > resident_budget and n_tile % 256 == 0:
            n_tile //= 2                         # stays a multiple of 128, divides out_features
    num_n_tiles = out_features // n_tile
    weight_resident = num_n_tiles == 1
    wt_buf_count = 1 if weight_resident else 2   # single-buffer the invariant weight
    wt_bytes_vmem = wt_buf_count * in_features * n_tile * itemsize

    # ---- batch (M) tiling: sublane-aligned, amortizes per-step pipeline overhead ----
    sublane = 16 if itemsize == 2 else 8
    b_tile = min(max_batch_tile, _round_up(B, sublane))
    b_tile = max(sublane, _round_up(b_tile, sublane))
    while b_tile > sublane and (
            2 * b_tile * (in_features + n_tile) * itemsize > vmem_budget - wt_bytes_vmem):
        b_tile = max(sublane, _round_up(b_tile // 2, sublane))
    num_b_tiles = pl.cdiv(B, b_tile)             # ragged last block handled by Pallas

    # ---- VMEM limit: double-buffered x/y tiles + weight slab + bias, with headroom ----
    need = (2 * b_tile * (in_features + n_tile) * itemsize
            + wt_bytes_vmem
            + wt_buf_count * n_tile * 4)
    vmem_limit = int(min(max(int(1.25 * need), 32 * 1024 * 1024), vmem_budget))

    grid = (num_b_tiles, num_n_tiles)
    wt_buf = 1 if weight_resident else None      # None -> default double-buffered stream

    out = pl.pallas_call(
        _phm_linear_kernel,
        out_shape=jax.ShapeDtypeStruct((B, out_features), w_t.dtype),
        grid_spec=pltpu.PrefetchScalarGridSpec(
            num_scalar_prefetch=0,
            grid=grid,
            in_specs=[
                # x: streamed over the batch axis.
                # TODO(synk): on v7x sweep pl.Buffered(3) here once VMEM headroom exists.
                _block_spec((b_tile, in_features), lambda i, j: (i, 0)),
                # W_T: resident (single-buffered) or streamed over the N axis.
                _block_spec((in_features, n_tile), lambda i, j: (0, j), buffer_count=wt_buf),
                # bias (f32): resident / streamed with W_T.
                _block_spec((1, n_tile), lambda i, j: (0, j), buffer_count=wt_buf),
            ],
            out_specs=_block_spec((b_tile, n_tile), lambda i, j: (i, j)),
        ),
        compiler_params=pltpu.CompilerParams(
            # Both axes independent: megacore (v7x) can shard either batch or N tiles.
            dimension_semantics=("parallel", "parallel"),
            vmem_limit_bytes=vmem_limit,
        ),
    )(x, w_t, bias2d)

    return out


def _reference(x, A, S, bias):
    # Pure-JAX reference mirroring kronecker_product1 + sum(dim=0) + F.linear.
    W = jnp.einsum("ipr,iqs->pqrs", A, S)
    W = W.reshape(A.shape[1] * S.shape[1], A.shape[2] * S.shape[2])
    return x @ W.T + bias


if __name__ == "__main__":
    n = 4
    in_features = 32
    out_features = 32
    batch = 8

    key = jax.random.PRNGKey(0)
    k_a, k_s, k_b, k_x = jax.random.split(key, 4)

    # Deterministic synthetic parameter init (mirrors __init__ shapes):
    bound_a = (6.0 / (n * n + n * n)) ** 0.5
    A = jax.random.uniform(k_a, (n, n, n), jnp.float32, -bound_a, bound_a)
    bound_s = (6.0 / (out_features // n + in_features // n)) ** 0.5
    S = jax.random.uniform(k_s, (n, out_features // n, in_features // n),
                           jnp.float32, -bound_s, bound_s)
    bound_b = 1.0 / (in_features ** 0.5)
    bias = jax.random.uniform(k_b, (out_features,), jnp.float32, -bound_b, bound_b)
    x = jax.random.normal(k_x, (batch, in_features), jnp.float32)

    y_ref = _reference(x, A, S, bias)

    # f32 path: bit-for-bit-ish match vs the PyTorch-equivalent reference.
    y = jax.block_until_ready(phm_linear(x, A, S, bias, n=n))
    assert y.shape == (batch, out_features)
    assert jnp.allclose(y, y_ref, atol=1e-5, rtol=1e-5), "f32 mismatch vs reference"

    # bf16 weight/activation path (native MXU dtype, f32 accumulation): looser tolerance.
    y_bf16 = jax.block_until_ready(
        phm_linear(x, A, S, bias, n=n, compute_dtype=jnp.bfloat16))
    assert y_bf16.shape == (batch, out_features)
    assert jnp.allclose(y_bf16.astype(jnp.float32), y_ref, atol=1e-1, rtol=1e-1), \
        "bf16 mismatch vs reference"

    print("KERNEL_OK")
</pallas_src>

<mosaic_0001>
module attributes {stable_mosaic.version = 11 : i64} {
  func.func @_phm_linear_kernel(%arg0: i32, %arg1: i32, %arg2: memref<8x32xf32, #tpu.memory_space<vmem>>, %arg3: memref<32x32xf32, #tpu.memory_space<vmem>>, %arg4: memref<1x32xf32, #tpu.memory_space<vmem>>, %arg5: memref<8x32xf32, #tpu.memory_space<vmem>>) attributes {dimension_semantics = [#tpu.dimension_semantics<parallel>, #tpu.dimension_semantics<parallel>], iteration_bounds = array<i64: 1, 1>, scalar_prefetch = 0 : i64, scratch_operands = 0 : i64, tpu.core_type = #tpu.core_type<tc>, window_params = [{transform_indices = @transform_0, window_bounds = array<i64: 8, 32>}, {pipeline_mode = #tpu.pipeline_mode<synchronous>, transform_indices = @transform_1, window_bounds = array<i64: 32, 32>}, {pipeline_mode = #tpu.pipeline_mode<synchronous>, transform_indices = @transform_2, window_bounds = array<i64: 1, 32>}, {transform_indices = @transform_3, window_bounds = array<i64: 8, 32>}]} {
    %c0 = arith.constant 0 : index
    %c0_0 = arith.constant 0 : index
    %0 = vector.load %arg2[%c0, %c0_0] : memref<8x32xf32, #tpu.memory_space<vmem>>, vector<8x32xf32>
    %c0_1 = arith.constant 0 : index
    %c0_2 = arith.constant 0 : index
    %1 = vector.load %arg3[%c0_1, %c0_2] : memref<32x32xf32, #tpu.memory_space<vmem>>, vector<32x32xf32>
    %cst = arith.constant dense<0.000000e+00> : vector<8x32xf32>
    %2 = tpu.matmul %0, %1, %cst {dimension_numbers = #tpu.dot_dimension_numbers<[1], [0], [0], [1], [0, 0, 1, 1], [], []>} : vector<8x32xf32>, vector<32x32xf32>, vector<8x32xf32> -> vector<8x32xf32>
    %c0_3 = arith.constant 0 : index
    %c0_4 = arith.constant 0 : index
    %3 = vector.load %arg4[%c0_3, %c0_4] : memref<1x32xf32, #tpu.memory_space<vmem>>, vector<1x32xf32>
    %4 = vector.broadcast %3 : vector<1x32xf32> to vector<8x32xf32>
    %5 = arith.addf %2, %4 : vector<8x32xf32>
    %c0_5 = arith.constant 0 : index
    %c0_6 = arith.constant 0 : index
    %6 = vector.load %arg5[%c0_5, %c0_6] : memref<8x32xf32, #tpu.memory_space<vmem>>, vector<8x32xf32>
    tpu.vector_store %arg5[%c0_5, %c0_6], %5 {strides = array<i32>} : memref<8x32xf32, #tpu.memory_space<vmem>>, vector<8x32xf32>,
    return
  }
  func.func @transform_0(%arg0: i32, %arg1: i32) -> (i32, i32) {
    %c0_i32 = arith.constant 0 : i32
    %c0_i32_0 = arith.constant 0 : i32
    return %arg0, %c0_i32 : i32, i32
  }
  func.func @transform_1(%arg0: i32, %arg1: i32) -> (i32, i32) {
    %c0_i32 = arith.constant 0 : i32
    %c0_i32_0 = arith.constant 0 : i32
    return %c0_i32, %arg1 : i32, i32
  }
  func.func @transform_2(%arg0: i32, %arg1: i32) -> (i32, i32) {
    %c0_i32 = arith.constant 0 : i32
    %c0_i32_0 = arith.constant 0 : i32
    return %c0_i32, %arg1 : i32, i32
  }
  func.func @transform_3(%arg0: i32, %arg1: i32) -> (i32, i32) {
    %c0_i32 = arith.constant 0 : i32
    return %arg0, %arg1 : i32, i32
  }
}

</mosaic_0001>

<bundles_post_ra>
// kernel: tpu_custom_call.1
= control target key start
LH: loop header
LB: loop body
LE: loop exit
PB: predicated region body
PF: predicated region fallthrough
CT: control target
= control target key end

     0   :  { %8 = vsyncpa [#allocation3], 0  ;;  %s219_s0 = inlined_call_operand.hbm [shape: f32[8,32], index: 0, kind: input, shape index: {}]   ;;  %s220_s1 = inlined_call_operand.hbm [shape: f32[32,32], index: 1, kind: input, shape index: {}]   ;;  %s221_s2 = inlined_call_operand.vmem [shape: f32[1,32], index: 2, kind: input, shape index: {}]   ;;  %s222_s3 = inlined_call_operand.hbm [shape: f32[8,32], index: 3, kind: output, shape index: {}]  }
   0x1   :  { %9 = vsyncpa [#allocation6], 0 }
   0x2   :  { %10 = vsyncpa [#allocation4], 0  ;;  %s16_s14 = sshll.u32 %s219_s0, 4  ;;  %s182_s15 = smov [#allocation2]   ;;  %s17_s14 = int_to_ptr.hbm [resolvable:$true] %s16_s14 }
   0x3   :  { %s18_s16 = sshll.u32 %s182_s15, 4  ;;  %s26_s19 = sshll.u32 %s220_s1, 4  ;;  %s19_s16 = int_to_ptr.vmem [resolvable:$true] %s18_s16  ;;  %s27_s19 = int_to_ptr.hbm [resolvable:$true] %s26_s19 }
   0x4   :  { %21 = dma.hbm_to_vmem [thread:$0]  %s17_s14, 128, %s19_s16, [#allocation3]  }
   0x5   :  { %s183_s20 = smov [#allocation5]   ;;  %s184_s22 = smov 128  }
   0x6   :  { %s28_s21 = sshll.u32 %s183_s20, 4  ;;  %s185_s23 = smov 8   ;;  %s29_s21 = int_to_ptr.vmem [resolvable:$true] %s28_s21 }
   0x7   :  { %34 = dma.hbm_to_vmem [thread:$0]  %s27_s19, 512, %s29_s21, [#allocation6], %s184_s22, %s184_s22, %s185_s23  }
   0x8   :  { %176 = dma.done.wait [#allocation3], 128  }
   0x9   :  { %177 = vsyncadd [#allocation3], 4294967168 }
   0xa   :  { %178 = dma.done.wait [#allocation6], 512  }
   0xb   :  { %179 = vsyncadd [#allocation6], 4294966784  ;;  %v49_v0 = vld [vmem:[#allocation5 + $0x18] sm:$0xff]  ;;  %v48_v1 = vld [vmem:[#allocation5 + $0x10] sm:$0xff]  ;;  %vm54_vm0 = vcmask 261120   ;;  %s186_s24 = smov [#allocation7]  }
   0xc   :  { %70 = vmatpush.msra.mxu0 %v49_v0  ;;  %v47_v2 = vld [vmem:[#allocation5 + $0x8] sm:$0xff]  ;;  %v46_v3 = vld [vmem:[#allocation5] sm:$0xff]  ;;  %v45_v4 = vld [vmem:[#allocation2] sm:$0xff]  ;;  %s84_s25 = sshll.u32 %s186_s24, 4  ;;  %s86_s28 = sshll.u32 %s222_s3, 4  ;;  %s85_s25 = int_to_ptr.vmem [resolvable:$true] %s84_s25  ;;  %s87_s28 = int_to_ptr.hbm [resolvable:$true] %s86_s28 }
   0xd   :  { %v103_v5 = vld [vmem:[%s221_s2] ss:$0 sm:$0xff] }
   0xe   :  { %71 = vmatpush.msra.mxu0 %v48_v1 }
  0x10   :  { %72 = vmatpush.msra.mxu0 %v47_v2 }
  0x12   :  { %73 = vmatpush.msra.mxu0 %v46_v3 }
  0x13   :  { %97 = vmatmul.msk.f32.vlgmr.msra.gmra.mxu0 %vm54_vm0, %v45_v4 }
  0x90   :  { %v75_v6 = vpop.f32.mrf.mxu0 }
  0x91   :  { %v76_v7 = vadd.f32 %v103_v5, %v75_v6 }
  0x93   :  { %78 = vst.msk [vmem:[#allocation7] sm:$0xff] %vm54_vm0, %v76_v7 }
  0x94   :  { %89 = dma.vmem_to_hbm [thread:$0]  %s85_s25, 128, %s87_s28, [#allocation4]  }
  0x95   :  { %180 = dma.done.wait [#allocation4], 128  }
  0x96   :  { %181 = vsyncadd [#allocation4], 4294967168 }
  0x97   :  { %94 = vsyncpa [#allocation3], 1 }
  0x98   :  { %95 = vsyncpa [#allocation6], 1 }
  0x99   :  { %96 = vsyncpa [#allocation4], 1 }

</bundles_post_ra>
